<compile_context>
chip_gen: v7x
topology: tpu7x:2x2x1
jax: 0.10.0
libtpu: 0.0.40
codegen_flags: <defaults>
</compile_context>

<pallas_src>
import functools

import jax
import jax.numpy as jnp
from jax.experimental import pallas as pl
from jax.experimental.pallas import tpu as pltpu


# ----------------------------------------------------------------------------
# Kernel 1: pipelined spatial-mean reduction + fused SE epilogue
# ----------------------------------------------------------------------------
def _attention_kernel(x_ref, w1t_ref, w4t_ref, sc_ref, o_ref, acc_ref, *,
                      inv_hw):
    # x_ref : (1, C, THW)   w1t_ref: (C, hc)   w4t_ref: (hc, C)
    # sc_ref: SMEM (2,) = [w2, w3]   o_ref: (1, 1, C)   acc_ref: (1, C) f32
    k = pl.program_id(1)

    @pl.when(k == 0)
    def _init():
        acc_ref[...] = jnp.zeros_like(acc_ref)

    x = x_ref[...].astype(jnp.float32)              # (1, C, THW)
    acc_ref[...] += jnp.sum(x, axis=-1)             # running spatial sum

    @pl.when(k == pl.num_programs(1) - 1)
    def _epilogue():
        avg = acc_ref[...] * inv_hw                                   # (1, C)
        w2 = sc_ref[0]                                                # scalar
        w3 = sc_ref[1]                                                # scalar
        # conv1 (1x1, no bias); weights pre-transposed -> no in-kernel .T
        h = jnp.dot(avg, w1t_ref[...].astype(jnp.float32),
                    preferred_element_type=jnp.float32)               # (1, hc)
        # conv2 (scalar) + softmax over the hidden-channel axis
        z = w2 * h
        z = z - jnp.max(z, axis=-1, keepdims=True)
        e = jnp.exp(z)
        s = e / jnp.sum(e, axis=-1, keepdims=True)
        # matmul with diag(softmax) == elementwise; conv3 (scalar) + relu
        y = jnp.maximum(w3 * (h * s), 0.0)                            # (1, hc)
        # conv4 (1x1, no bias) + sigmoid
        logits = jnp.dot(y, w4t_ref[...].astype(jnp.float32),
                         preferred_element_type=jnp.float32)          # (1, C)
        att = 1.0 / (1.0 + jnp.exp(-logits))
        o_ref[0] = att.astype(o_ref.dtype)


# ----------------------------------------------------------------------------
# Kernel 2: tiled broadcast multiply  out = x * att
# ----------------------------------------------------------------------------
def _scale_kernel(x_ref, a_ref, o_ref):
    # x_ref: (1, C, THW)   a_ref: (1, C, 1)   o_ref: (1, C, THW)
    x = x_ref[...].astype(jnp.float32)
    a = a_ref[...].astype(jnp.float32)
    o_ref[...] = (x * a).astype(o_ref.dtype)


def se_attention(x, w1, w2, w3, w4, *, spatial_tile=512):
    """SEAttention forward.

    x : (B, C, H, W); w1: (hc, C) conv1 weight; w2, w3: scalar Conv1d weights;
    w4: (C, hc) conv4 weight.  Returns (B, C, H, W) = x * attention.
    """
    B, C, H, W = x.shape
    hc = w1.shape[0]
    HW = H * W

    # Spatial tiling: lane-dense tiles (multiple of 128); pad HW with zeros if
    # needed (mean is normalised by the true HW, so zero padding is exact).
    if HW <= spatial_tile:
        thw, hw_pad = HW, HW          # single full-extent tile
    else:
        thw = spatial_tile
        hw_pad = pl.cdiv(HW, thw) * thw
    n_hw = hw_pad // thw

    x_flat = x.reshape(B, C, HW)
    if hw_pad != HW:
        x_flat = jnp.pad(x_flat, ((0, 0), (0, 0), (0, hw_pad - HW)))

    w1t = jnp.asarray(w1).T                                     # (C, hc)
    w4t = jnp.asarray(w4).T                                     # (hc, C)
    scal = jnp.stack([jnp.asarray(w2, jnp.float32),
                      jnp.asarray(w3, jnp.float32)])            # (2,)

    itemsize = int(jnp.dtype(x.dtype).itemsize)
    x_bytes = int(B * C * hw_pad * itemsize)

    # ---- pass 1: avg-pool (tiled accumulation) + fused SE epilogue ----------
    att = pl.pallas_call(
        functools.partial(_attention_kernel, inv_hw=1.0 / float(HW)),
        out_shape=jax.ShapeDtypeStruct((B, 1, C), jnp.float32),
        grid_spec=pltpu.PrefetchScalarGridSpec(
            num_scalar_prefetch=0,
            grid=(B, n_hw),
            in_specs=[
                pl.BlockSpec((1, C, thw), lambda b, k: (b, 0, k)),
                pl.BlockSpec((C, hc), lambda b, k: (0, 0)),
                pl.BlockSpec((hc, C), lambda b, k: (0, 0)),
                pl.BlockSpec(memory_space=pltpu.MemorySpace.SMEM),
            ],
            out_specs=pl.BlockSpec((1, 1, C), lambda b, k: (b, 0, 0)),
            scratch_shapes=[pltpu.VMEM((1, C), jnp.float32)],
        ),
        compiler_params=pltpu.CompilerParams(
            dimension_semantics=("parallel", "arbitrary")),
        cost_estimate=pl.CostEstimate(
            flops=int(B * C * hw_pad + 4 * B * C * hc),
            transcendentals=int(B * (hc + C)),
            bytes_accessed=int(x_bytes + (2 * C * hc + B * C) * 4)),
    )(x_flat, w1t, w4t, scal)

    # ---- pass 2: out = x * att (broadcast over spatial) ---------------------
    att_col = att.reshape(B, C, 1)      # channels onto the sublane axis
    out = pl.pallas_call(
        _scale_kernel,
        out_shape=jax.ShapeDtypeStruct((B, C, hw_pad), x.dtype),
        grid_spec=pltpu.PrefetchScalarGridSpec(
            num_scalar_prefetch=0,
            grid=(B, n_hw),
            in_specs=[
                pl.BlockSpec((1, C, thw), lambda b, k: (b, 0, k)),
                pl.BlockSpec((1, C, 1), lambda b, k: (b, 0, 0)),
            ],
            out_specs=pl.BlockSpec((1, C, thw), lambda b, k: (b, 0, k)),
        ),
        compiler_params=pltpu.CompilerParams(
            dimension_semantics=("parallel", "parallel")),
        cost_estimate=pl.CostEstimate(
            flops=int(B * C * hw_pad),
            transcendentals=0,
            bytes_accessed=int(2 * x_bytes + B * C * 4)),
    )(x_flat, att_col)

    if hw_pad != HW:
        out = out[:, :, :HW]
    return out.reshape(B, C, H, W)


def reference_jax(x, w1, w2, w3, w4):
    # Pure-JAX reference matching the PyTorch forward.
    avg = jnp.mean(x, axis=(2, 3))                       # (B, C)
    h = avg @ w1.T                                       # (B, hc)
    s = jax.nn.softmax(w2 * h, axis=-1)
    y = jnp.maximum(w3 * (h * s), 0.0)
    att = jax.nn.sigmoid(y @ w4.T)                       # (B, C)
    return x * att[:, :, None, None]


if __name__ == "__main__":
    B, C, H, W = 2, 64, 32, 32
    ratio = 16
    hc = C // ratio  # 4

    key = jax.random.PRNGKey(0)
    kx, k1, k2, k3, k4 = jax.random.split(key, 5)

    x = jax.random.normal(kx, (B, C, H, W), dtype=jnp.float32)
    # conv1 / conv4: 1x1 convs (bias=False) -> plain weight matrices.
    w1 = jax.random.normal(k1, (hc, C), dtype=jnp.float32) * (1.0 / C) ** 0.5
    w4 = jax.random.normal(k4, (C, hc), dtype=jnp.float32) * (1.0 / hc) ** 0.5
    # conv2 / conv3: Conv1d(1, 1, kernel_size=1, bias=False) -> scalar weights.
    w2 = jax.random.normal(k2, (), dtype=jnp.float32) * 0.5 + 1.0
    w3 = jax.random.normal(k3, (), dtype=jnp.float32) * 0.1 + 1.0

    out = se_attention(x, w1, w2, w3, w4)
    out = jax.block_until_ready(out)

    ref = reference_jax(x, w1, w2, w3, w4)
    assert out.shape == (B, C, H, W)
    assert jnp.allclose(out, ref, atol=1e-4, rtol=1e-4), float(
        jnp.max(jnp.abs(out - ref)))

    print("KERNEL_OK")
</pallas_src>

<mosaic_0001>
module attributes {stable_mosaic.version = 11 : i64} {
  func.func @_attention_kernel(%arg0: i32, %arg1: i32, %arg2: memref<1x64x512xf32, #tpu.memory_space<vmem>>, %arg3: memref<64x4xf32, #tpu.memory_space<vmem>>, %arg4: memref<4x64xf32, #tpu.memory_space<vmem>>, %arg5: memref<2xf32, #tpu.memory_space<smem>>, %arg6: memref<1x1x64xf32, #tpu.memory_space<vmem>>, %arg7: memref<1x64xf32, #tpu.memory_space<vmem>>) attributes {dimension_semantics = [#tpu.dimension_semantics<parallel>, #tpu.dimension_semantics<arbitrary>], iteration_bounds = array<i64: 2, 2>, scalar_prefetch = 0 : i64, scratch_operands = 1 : i64, tpu.core_type = #tpu.core_type<tc>, window_params = [{transform_indices = @transform_0, window_bounds = array<i64: 1, 64, 512>}, {pipeline_mode = #tpu.pipeline_mode<synchronous>, transform_indices = @transform_1, window_bounds = array<i64: 64, 4>}, {pipeline_mode = #tpu.pipeline_mode<synchronous>, transform_indices = @transform_2, window_bounds = array<i64: 4, 64>}, {transform_indices = @transform_3, window_bounds = array<i64: 2>}, {transform_indices = @transform_4, window_bounds = array<i64: 1, 1, 64>}]} {
    %c0_i32 = arith.constant 0 : i32
    %0 = arith.cmpi eq, %arg1, %c0_i32 : i32
    %1 = arith.extui %0 : i1 to i32
    %c0_i32_0 = arith.constant 0 : i32
    %2 = arith.cmpi ne, %1, %c0_i32_0 : i32
    scf.if %2 {
      %cst_8 = arith.constant 0.000000e+00 : f32
      %11 = vector.broadcast %cst_8 : f32 to vector<1x64xf32>
      %c0_9 = arith.constant 0 : index
      %c0_10 = arith.constant 0 : index
      %12 = vector.load %arg7[%c0_9, %c0_10] : memref<1x64xf32, #tpu.memory_space<vmem>>, vector<1x64xf32>
      tpu.vector_store %arg7[%c0_9, %c0_10], %11 {strides = array<i32>} : memref<1x64xf32, #tpu.memory_space<vmem>>, vector<1x64xf32>,
    } else {
    }
    %c0 = arith.constant 0 : index
    %c0_1 = arith.constant 0 : index
    %c0_2 = arith.constant 0 : index
    %3 = vector.load %arg2[%c0, %c0_1, %c0_2] : memref<1x64x512xf32, #tpu.memory_space<vmem>>, vector<1x64x512xf32>
    %c0_3 = arith.constant 0 : index
    %c0_4 = arith.constant 0 : index
    %4 = vector.load %arg7[%c0_3, %c0_4] : memref<1x64xf32, #tpu.memory_space<vmem>>, vector<1x64xf32>
    %cst = arith.constant dense<0.000000e+00> : vector<1x64xf32>
    %5 = vector.multi_reduction <add>, %3, %cst [2] : vector<1x64x512xf32> to vector<1x64xf32>
    %6 = arith.addf %4, %5 : vector<1x64xf32>
    %c0_5 = arith.constant 0 : index
    %c0_6 = arith.constant 0 : index
    %7 = vector.load %arg7[%c0_5, %c0_6] : memref<1x64xf32, #tpu.memory_space<vmem>>, vector<1x64xf32>
    tpu.vector_store %arg7[%c0_5, %c0_6], %6 {strides = array<i32>} : memref<1x64xf32, #tpu.memory_space<vmem>>, vector<1x64xf32>,
    %c1_i32 = arith.constant 1 : i32
    %8 = arith.cmpi eq, %arg1, %c1_i32 : i32
    %9 = arith.extui %8 : i1 to i32
    %c0_i32_7 = arith.constant 0 : i32
    %10 = arith.cmpi ne, %9, %c0_i32_7 : i32
    scf.if %10 {
      %c0_8 = arith.constant 0 : index
      %c0_9 = arith.constant 0 : index
      %11 = vector.load %arg7[%c0_8, %c0_9] : memref<1x64xf32, #tpu.memory_space<vmem>>, vector<1x64xf32>
      %cst_10 = arith.constant 9.765625E-4 : f32
      %12 = vector.broadcast %cst_10 : f32 to vector<1x64xf32>
      %13 = arith.mulf %11, %12 : vector<1x64xf32>
      %c0_11 = arith.constant 0 : index
      %14 = memref.load %arg5[%c0_11] : memref<2xf32, #tpu.memory_space<smem>>
      %c1 = arith.constant 1 : index
      %15 = memref.load %arg5[%c1] : memref<2xf32, #tpu.memory_space<smem>>
      %c0_12 = arith.constant 0 : index
      %c0_13 = arith.constant 0 : index
      %16 = vector.load %arg3[%c0_12, %c0_13] : memref<64x4xf32, #tpu.memory_space<vmem>>, vector<64x4xf32>
      %cst_14 = arith.constant dense<0.000000e+00> : vector<1x4xf32>
      %17 = tpu.matmul %13, %16, %cst_14 {dimension_numbers = #tpu.dot_dimension_numbers<[1], [0], [0], [1], [0, 0, 1, 1], [], []>} : vector<1x64xf32>, vector<64x4xf32>, vector<1x4xf32> -> vector<1x4xf32>
      %18 = vector.broadcast %14 : f32 to vector<1x4xf32>
      %19 = arith.mulf %18, %17 : vector<1x4xf32>
      %cst_15 = arith.constant dense<0xFF800000> : vector<1xf32>
      %20 = vector.multi_reduction <maximumf>, %19, %cst_15 [1] : vector<1x4xf32> to vector<1xf32>
      %21 = vector.shape_cast %20 : vector<1xf32> to vector<1x1xf32>
      %22 = vector.broadcast %21 : vector<1x1xf32> to vector<1x4xf32>
      %23 = arith.subf %19, %22 : vector<1x4xf32>
      %24 = math.exp %23 : vector<1x4xf32>
      %cst_16 = arith.constant dense<0.000000e+00> : vector<1xf32>
      %25 = vector.multi_reduction <add>, %24, %cst_16 [1] : vector<1x4xf32> to vector<1xf32>
      %26 = vector.shape_cast %25 : vector<1xf32> to vector<1x1xf32>
      %27 = vector.broadcast %26 : vector<1x1xf32> to vector<1x4xf32>
      %28 = arith.divf %24, %27 : vector<1x4xf32>
      %29 = arith.mulf %17, %28 : vector<1x4xf32>
      %30 = vector.broadcast %15 : f32 to vector<1x4xf32>
      %31 = arith.mulf %30, %29 : vector<1x4xf32>
      %cst_17 = arith.constant 0.000000e+00 : f32
      %32 = vector.broadcast %cst_17 : f32 to vector<1x4xf32>
      %33 = arith.maximumf %31, %32 : vector<1x4xf32>
      %c0_18 = arith.constant 0 : index
      %c0_19 = arith.constant 0 : index
      %34 = vector.load %arg4[%c0_18, %c0_19] : memref<4x64xf32, #tpu.memory_space<vmem>>, vector<4x64xf32>
      %cst_20 = arith.constant dense<0.000000e+00> : vector<1x64xf32>
      %35 = tpu.matmul %33, %34, %cst_20 {dimension_numbers = #tpu.dot_dimension_numbers<[1], [0], [0], [1], [0, 0, 1, 1], [], []>} : vector<1x4xf32>, vector<4x64xf32>, vector<1x64xf32> -> vector<1x64xf32>
      %cst_21 = arith.constant 0.000000e+00 : f32
      %36 = vector.broadcast %cst_21 : f32 to vector<1x64xf32>
      %37 = arith.subf %36, %35 : vector<1x64xf32>
      %38 = math.exp %37 : vector<1x64xf32>
      %cst_22 = arith.constant 1.000000e+00 : f32
      %39 = vector.broadcast %cst_22 : f32 to vector<1x64xf32>
      %40 = arith.addf %39, %38 : vector<1x64xf32>
      %cst_23 = arith.constant 1.000000e+00 : f32
      %41 = vector.broadcast %cst_23 : f32 to vector<1x64xf32>
      %42 = arith.divf %41, %40 : vector<1x64xf32>
      %c0_24 = arith.constant 0 : index
      %c0_25 = arith.constant 0 : index
      %c0_26 = arith.constant 0 : index
      %43 = vector.load %arg6[%c0_24, %c0_25, %c0_26] : memref<1x1x64xf32, #tpu.memory_space<vmem>>, vector<1x1x64xf32>
      %44 = vector.shape_cast %43 : vector<1x1x64xf32> to vector<1x64xf32>
      %45 = vector.shape_cast %42 : vector<1x64xf32> to vector<1x1x64xf32>
      tpu.vector_store %arg6[%c0_24, %c0_25, %c0_26], %45 {strides = array<i32>} : memref<1x1x64xf32, #tpu.memory_space<vmem>>, vector<1x1x64xf32>,
    } else {
    }
    return
  }
  func.func @transform_0(%arg0: i32, %arg1: i32) -> (i32, i32, i32) {
    %c0_i32 = arith.constant 0 : i32
    %c0_i32_0 = arith.constant 0 : i32
    return %arg0, %c0_i32, %arg1 : i32, i32, i32
  }
  func.func @transform_1(%arg0: i32, %arg1: i32) -> (i32, i32) {
    %c0_i32 = arith.constant 0 : i32
    %c0_i32_0 = arith.constant 0 : i32
    %c0_i32_1 = arith.constant 0 : i32
    return %c0_i32, %c0_i32_0 : i32, i32
  }
  func.func @transform_2(%arg0: i32, %arg1: i32) -> (i32, i32) {
    %c0_i32 = arith.constant 0 : i32
    %c0_i32_0 = arith.constant 0 : i32
    %c0_i32_1 = arith.constant 0 : i32
    return %c0_i32, %c0_i32_0 : i32, i32
  }
  func.func @transform_3(%arg0: i32, %arg1: i32) -> i32 {
    %c0_i32 = arith.constant 0 : i32
    %c0_i32_0 = arith.constant 0 : i32
    return %c0_i32 : i32
  }
  func.func @transform_4(%arg0: i32, %arg1: i32) -> (i32, i32, i32) {
    %c0_i32 = arith.constant 0 : i32
    %c0_i32_0 = arith.constant 0 : i32
    %c0_i32_1 = arith.constant 0 : i32
    return %arg0, %c0_i32, %c0_i32_0 : i32, i32, i32
  }
}

</mosaic_0001>

<bundles_post_ra>
// kernel: tpu_custom_call.1
= control target key start
LH: loop header
LB: loop body
LE: loop exit
PB: predicated region body
PF: predicated region fallthrough
CT: control target
= control target key end

     0   :  { %s2251_s0 = inlined_call_operand.hbm [shape: f32[2,64,1024], index: 0, kind: input, shape index: {}]   ;;  %s2252_s1 = inlined_call_operand.vmem [shape: f32[64,4], index: 1, kind: input, shape index: {}]   ;;  %s2253_s2 = inlined_call_operand.vmem [shape: f32[4,64], index: 2, kind: input, shape index: {}]   ;;  %s2254_s3 = inlined_call_operand.vmem [shape: f32[2], index: 3, kind: input, shape index: {}]   ;;  %s2255_s4 = inlined_call_operand.hbm [shape: f32[2,1,64], index: 4, kind: output, shape index: {}]  }
   0x1   :  { %2266 = sst [smem:[#allocation18_spill]] %s2254_s3 }
   0x2   :  { %9 = vsyncpa [#allocation4], 0 }
   0x3   :  { %11 = vsyncpa [#allocation4 + $0x1], 0 }
   0x4   :  { %12 = vsyncpa [#allocation6], 0 }
   0x5   :  { %13 = vsyncpa [#allocation5], 0 }
   0x6   :  { %15 = vsyncpa [#allocation5 + $0x1], 0  ;;  %s1787_s15 = smov 0   ;;  %s1789_s16 = smov 0  }
   0x7   :  { %s1791_s17 = smov 0   ;;  %s1793_s18 = smov 0  }
   0x8   :  { %s1795_s19 = smov 0   ;;  %s1797_s20 = smov 0  }
   0x9   :  { %s1799_s21 = smov 0   ;;  %s1801_s22 = smov 0  }
   0xa   :  { %s1803_s23 = smov 0   ;;  %s1805_s24 = smov 0  }
   0xb   :  { %s1807_s25 = smov 0  }
   0xc LB: > { %2267 = sst [smem:[#allocation12_spill]] %s1708_s15  ;;  %s1377_s26 = sadd.s32 4294967295, %s1748_s25   ;;  %s1748_s25 = sphi %s1807_s25, %s21_s25   ;;  %s1744_s24 = sphi %s1805_s24, %s2300_s24   ;;  %s1740_s23 = sphi %s1803_s23, %s2291_s23   ;;  %s1736_s22 = sphi %s1801_s22, %s2299_s22   ;;  %s1732_s21 = sphi %s1799_s21, %s2290_s21   ;;  %s1728_s20 = sphi %s1797_s20, %s2298_s20   ;;  %s1724_s19 = sphi %s1795_s19, %s2297_s19   ;;  %s1720_s18 = sphi %s1793_s18, %s2296_s18   ;;  %s1716_s17 = sphi %s1791_s17, %s2295_s17   ;;  %s1712_s16 = sphi %s1789_s16, %s2294_s16   ;;  %s1708_s15 = sphi %s1787_s15, %s2293_s15  }
   0xd   : > { %2268 = sst [smem:[#allocation13_spill]] %s1740_s23  ;;  %s1378_s27 = sadd.s32 4294967294, %s1748_s25  }
   0xe   : > { %2269 = sst [smem:[#allocation14_spill]] %s1748_s25  ;;  %p49_p0 = scmp.ne.s32.totalorder %s1728_s20, %s1724_s19 }
   0xf   : > { %p50_p1 = scmp.eq.s32.totalorder %s1748_s25, 0  ;;  %p55_p2 = scmp.ne.s32.totalorder %s1724_s19, %s1720_s18 }
  0x10   : > { %p1847_p3 = scmp.eq.s32.totalorder %s1377_s26, 0  ;;  %p141_p5 = scmp.ne.s32.totalorder %s1716_s17, %s1712_s16 }
  0x11   : > { %p1852_p4 = por %p50_p1, %p49_p0  ;;  %p142_p7 = scmp.eq.s32.totalorder %s1377_s26, 3 }
  0x12   : > { %p1860_p6 = por %p1847_p3, %p55_p2  ;;  %p147_p8 = scmp.ne.s32.totalorder %s1712_s16, %s1708_s15 }
  0x13   : > { %p148_p9 = scmp.eq.s32.totalorder %s1378_s27, 3  ;;  %p1866_p10 = por %p142_p7, %p141_p5 }
  0x14   : > { %s2272_s6 = scalar_select %p1860_p6, 1, 0 }
  0x15   : > { %s2273_s7 = scalar_select %p1866_p10, 1, 0 }
  0x16   : > { %p1379_p11 = scmp.ge.s32.totalorder %s1748_s25, 1  ;;  %p1871_p12 = por %p148_p9, %p147_p8 }
  0x17   : > { %p155_p13 = scmp.lt.s32.totalorder %s1748_s25, 5  ;;  %s2276_s3 = sld [smem:[#allocation18_spill]] }
  0x18   : > { %s2274_s8 = scalar_select %p1871_p12, 1, 0 }
  0x19   : > { %p1879_p0 = pnand %p1379_p11, %p155_p13  ;;  %p1466_p2 = scmp.lt.s32.totalorder %s1748_s25, 4 }
  0x1a   : > { %2275 = sst [smem:[#allocation15_spill]] %s2274_s8 }
  0x1b   : > { %s2277_s12 = scalar_select %p1879_p0, 1, 0 }
  0x1c   : > { %p1453_p1 = pneg %p1879_p0  ;;  %p1890_p7 = pnand %p1466_p2, %p1852_p4 }
  0x1d   : > { %s174_s11 = sshll.u32 %s2276_s3, 4  ;;  %s175_s11 = int_to_ptr.vmem [resolvable:$true] %s174_s11 }
  0x1e   : > { %p1454_p5 = pnand %p1453_p1, %p1847_p3  ;;  %s1577_s14 = scalar_lea.vmem %s175_s11, 16 }
  0x1f   : > { %p1578_p8 = scmp.ne.s32.totalorder %s175_s11, %s1577_s14  ;;  %p1585_p13 = scmp.lt.s32.totalorder %s175_s11, %s175_s11 }
  0x20   : > { %p1579_p9 = pneg %p1454_p5  ;;  %p1586_p10 = scmp.lt.s32.totalorder %s1577_s14, %s1577_s14 }
  0x22   : > { %p1580_p12 = pnand %p1579_p9, %p1578_p8  ;;  %p1587_p6 = por %p1586_p10, %p1585_p13 }
  0x24   : > { %p1581_p11 = pneg %p1580_p12 }
  0x26   : > { %p1588_p0 = pnand %p1587_p6, %p1581_p11 }
  0x28   : > { %1591 = shalt.err (!%p1588_p0)
}
  0x29   : > { %s1750_s18 = smov [#allocation7]   ;;  %s30_s26 = sadd.s32 1, %s1740_s23 }
  0x2a   : > { %1456 = dma.vmem_to_smem (!%p1454_p5), %s175_s11, 16, %s1750_s18, [#allocation6]  }
  0x2b   : > { %s33_s27 = sadd.s32 1, %s1744_s24  ;;  %p31_p4 = scmp.ge.s32.totalorder %s30_s26, 2 }
  0x2c   : > { %s185_s5 = sand.u32 1, %s1728_s20   ;;  %s1383_s14 = sshll.u32 %s1740_s23, 2 }
  0x2d   : > { %s1382_s9 = sshll.u32 %s185_s5, 8  ;;  %s2302_s26 = smov (%p31_p4, %s30_s26), 0 }
  0x2e   : > { %2279 = sst [smem:[#allocation16_spill]] %s2302_s26  ;;  %s2304_s27 = smov (!%p31_p4, %s33_s27), %s1744_s24 }
  0x2f   : > { %s38_s10 = ssub.s32 %s1740_s23, %s2302_s26  ;;  %p35_p6 = scmp.ge.s32.totalorder %s2304_s27, 2 }
  0x30   : > { %s1384_s28 = sshll.u32 %s1744_s24, 6  ;;  %s189_s30 = scalar_lea.vmem [#allocation3], %s1382_s9 }
  0x31   : > { %s198_s11 = sshll.u32 %s189_s30, 4  ;;  %s2306_s27 = smov (%p35_p6, %s2304_s27), 0  ;;  %s1906_s11 = int_to_ptr.vmem [resolvable:$true] %s198_s11 }
  0x32   : > { %2280 = sst [smem:[#allocation17_spill]] %s2306_s27  ;;  %s195_s18 = sadd.s32 %s1384_s28, %s1383_s14 }
  0x33   : > { %s37_s3 = ssub.s32 %s1744_s24, %s2306_s27  ;;  %s1385_s8 = sshll.u32 %s195_s18, 7 }
  0x34   : > { %s39_s15 = sor.u32 %s38_s10, %s37_s3  ;;  %p129_p10 = scmp.eq.s32.totalorder %s37_s3, 0 }
  0x35   : > { %p40_p12 = scmp.eq.s32.totalorder %s39_s15, 0  ;;  %s1913_s23 = scalar_lea.hbm %s2251_s0, %s1385_s8 }
  0x36   : > { %s2281_s9 = sadd.s32 1, %s1716_s17  ;;  %s2282_s28 = sadd.s32 1, %s1728_s20 }
  0x37   : > { %s1918_s30 = scalar_select %p129_p10, %s1716_s17, %s2281_s9  }
  0x38   : > { %s1923_s14 = scalar_select %p40_p12, %s1728_s20, %s2282_s28  }
  0x39   : > { %s1925_s27 = scalar_lea.sflag [#allocation4], %s185_s5  ;;  %s1592_s10 = scalar_lea.hbm %s1913_s23, 4096 }
  0x3a   : > { %p1593_p0 = scmp.ne.s32.totalorder %s1913_s23, %s1592_s10  ;;  %p1594_p1 = pneg %p1890_p7 }
  0x3b   : > { %s1597_s25 = scalar_lea.hbm %s2251_s0, 16384  ;;  %p1598_p8 = scmp.lt.u32.totalorder %s1913_s23, %s2251_s0 }
  0x3c   : > { %p1595_p2 = pnand %p1594_p1, %p1593_p0  ;;  %p1599_p9 = scmp.lt.u32.totalorder %s1597_s25, %s1592_s10 }
  0x3d   : > { %p1601_p13 = scmp.lt.u32.totalorder %s1592_s10, %s1913_s23 }
  0x3e   : > { %p1596_p5 = pneg %p1595_p2  ;;  %p1600_p11 = por %p1599_p9, %p1598_p8 }
  0x40   : > { %p1602_p4 = por %p1601_p13, %p1600_p11 }
  0x42   : > { %p1603_p6 = pnand %p1602_p4, %p1596_p5 }
  0x44   : > { %1606 = shalt.err (!%p1603_p6)
}
  0x45   : > { %s1607_s5 = scalar_lea.vmem %s1906_s11, 4096  ;;  %s1751_s18 = smov [#allocation3]  }
  0x46   : > { %p1608_p10 = scmp.ne.s32.totalorder %s1906_s11, %s1607_s5  ;;  %s1612_s9 = sshll.u32 %s1751_s18, 4  ;;  %s1613_s9 = int_to_ptr.vmem [resolvable:$false] %s1612_s9 }
  0x47   : > { %s1614_s28 = scalar_lea.vmem %s1613_s9, 8192  ;;  %p1615_p2 = scmp.lt.s32.totalorder %s1906_s11, %s1613_s9 }
  0x48   : > { %p1610_p12 = pnand %p1608_p10, %p1594_p1  ;;  %p1616_p8 = scmp.lt.s32.totalorder %s1614_s28, %s1607_s5 }
  0x4a   : > { %p1611_p0 = pneg %p1610_p12  ;;  %p1617_p9 = por %p1616_p8, %p1615_p2 }
  0x4c   : > { %p1618_p11 = pnand %p1617_p9, %p1611_p0 }
  0x4e   : > { %1621 = shalt.err (!%p1618_p11)
}
  0x4f   : > { %s1752_s10 = smov 1024   ;;  %s1753_s3 = smov 512  }
  0x50   : > { %s1754_s15 = smov 32   ;;  %p2283_p1 = scmp.ne.s32.totalorder %s2277_s12, 0 }
  0x51   : > { %1460 = dma.hbm_to_vmem [thread:$0]  (!%p1890_p7), %s1913_s23, 4096, %s1906_s11, %s1925_s27, %s1752_s10, %s1753_s3, %s1754_s15  }
  0x52   : > { %210 = sbr.rel (%p2283_p1) target bundleno = 1252 (0x4e4), region = 36  ;;  %s212_s25 = sand.u32 (!%p2283_p1), 1, %s1724_s19  }
  0x53   : > { %s1387_s8 = sshll.u32 (!%p2283_p1), %s212_s25, 8  ;;  %s213_s26 = scalar_lea.sflag (!%p2283_p1), [#allocation4], %s212_s25 }
  0x54   : > { %s1956_s5 = scalar_lea.vmem (!%p2283_p1), [#allocation3], %s1387_s8  ;;  %p2284_p5 = scmp.ne.s32.totalorder (!%p2283_p1), %s2272_s6, 0 }
  0x59   : > { %1695 = dma.done.wait (%p2284_p5), %s213_s26, 4096  }
  0x5a   : > { %1697 = vsyncadd (%p2284_p5), %s213_s26, 4294963200 }
  0x5b   : > { %1699 = dma.done.wait (%p1847_p3), [#allocation6], 16  }
  0x5c   : > { %1701 = vsyncadd (%p1847_p3), [#allocation6], 4294967280 }
  0x5d   : > { %225 = sfence }
  0x5e   : > { %s243_s23 = sand.u32 1, %s1712_s16   ;;  %p1389_p7 = scmp.ne.s32.totalorder %s1732_s21, 0 }
  0x5f   : > { %s1969_s12 = scalar_lea.vmem [#allocation8], %s243_s23  ;;  %vm250_vm0 = vcmask (!%p1389_p7), 516096   ;;  %v1755_v0 = vmov (!%p1389_p7), 0.0  }
  0x60   : > { %249 = sbr.rel (%p1389_p7) target bundleno = 103 (0x67), region = 48  ;;  %251 = vst.msk [vmem:[#allocation2] sm:$0x1] (!%p1389_p7), %vm250_vm0, %v1755_v0 }
  0x67 PF: > { %v252_v1 = vld [vmem:[%s1956_s5] sm:$0xff]  ;;  %v253_v2 = vld [vmem:[%s1956_s5 + $0x8] sm:$0xff]  ;;  %v254_v3 = vld [vmem:[%s1956_s5 + $0x10] sm:$0xff]  ;;  %v1756_v57 = vmov 0   ;;  %v333_v58 = vlaneseq  ;;  %v1757_v59 = vmov 1966171168  }
  0x68   : > { %v285_v4 = vadd.f32 %v253_v2, %v252_v1  ;;  %v256_v5 = vld [vmem:[%s1956_s5 + $0x20] sm:$0xff]  ;;  %v257_v6 = vld [vmem:[%s1956_s5 + $0x28] sm:$0xff]  ;;  %v255_v7 = vld [vmem:[%s1956_s5 + $0x18] sm:$0xff]  ;;  %1567 = vset.pattern.permute.xlu0 %v1756_v57  ;;  %1568 = vset.pattern.permute.xlu1 %v1756_v57  ;;  %v594_v60 = vunpack.c.l.s4 %v1757_v59  ;;  %vm1016_vm1 = vcmask 130112   ;;  %vm1023_vm2 = vcmask 195712   ;;  %p1390_p3 = scmp.ne.s32.totalorder %s1732_s21, 1 }
  0x69   : > { %v258_v8 = vld [vmem:[%s1956_s5 + $0x30] sm:$0xff]  ;;  %v290_v9 = vadd.f32 %v257_v6, %v256_v5  ;;  %v260_v10 = vld [vmem:[%s1956_s5 + $0x40] sm:$0xff]  ;;  %v259_v12 = vld [vmem:[%s1956_s5 + $0x38] sm:$0xff]  ;;  %v2005_v61 = vshrl.u32 %v333_v58, 7  ;;  %vm1030_vm3 = vcmask 261312   ;;  %vm1037_vm4 = vcmask 326912  }
  0x6a   : > { %v286_v11 = vadd.f32 %v285_v4, %v254_v3  ;;  %v261_v13 = vld [vmem:[%s1956_s5 + $0x48] sm:$0xff]  ;;  %v262_v14 = vld [vmem:[%s1956_s5 + $0x50] sm:$0xff]  ;;  %v264_v17 = vld [vmem:[%s1956_s5 + $0x60] sm:$0xff]  ;;  %v595_v62 = vunpack.c.0.s8 %v594_v60  ;;  %vm1044_vm5 = vcmask 392512   ;;  %vm1051_vm6 = vcmask 458112   ;;  %s1084_s29 = sld [smem:[#allocation7]] (!%p1390_p3) }
  0x6b   : > { %v291_v15 = vadd.f32 %v290_v9, %v258_v8  ;;  %v295_v16 = vadd.f32 %v261_v13, %v260_v10  ;;  %v265_v18 = vld [vmem:[%s1956_s5 + $0x68] sm:$0xff]  ;;  %v266_v19 = vld [vmem:[%s1956_s5 + $0x70] sm:$0xff]  ;;  %v263_v21 = vld [vmem:[%s1956_s5 + $0x58] sm:$0xff]  ;;  %v2008_v63 = vsub.s32 0, %v2005_v61  ;;  %v2011_v0 = vsub.s32 1, %v2005_v61  ;;  %s1391_s27 = sld [smem:[#allocation7 + $0x1]] (!%p1390_p3) }
  0x6c   : > { %v287_v20 = vadd.f32 %v286_v11, %v255_v7  ;;  %v300_v22 = vadd.f32 %v265_v18, %v264_v17  ;;  %v268_v23 = vld [vmem:[%s1956_s5 + $0x80] sm:$0xff]  ;;  %v269_v24 = vld [vmem:[%s1956_s5 + $0x88] sm:$0xff]  ;;  %v267_v26 = vld [vmem:[%s1956_s5 + $0x78] sm:$0xff]  ;;  %v2014_v1 = vsub.s32 2, %v2005_v61  ;;  %v2017_v2 = vsub.s32 3, %v2005_v61 }
  0x6d   : > { %v296_v25 = vadd.f32 %v295_v16, %v262_v14  ;;  %v270_v27 = vld [vmem:[%s1956_s5 + $0x90] sm:$0xff]  ;;  %v305_v28 = vadd.f32 %v269_v24, %v268_v23  ;;  %v272_v29 = vld [vmem:[%s1956_s5 + $0xa0] sm:$0xff]  ;;  %v292_v30 = vadd.f32 %v291_v15, %v259_v12  ;;  %v271_v32 = vld [vmem:[%s1956_s5 + $0x98] sm:$0xff]  ;;  %v2020_v3 = vsub.s32 4, %v2005_v61 }
  0x6e   : > { %288 = vadd.xlane.f32.xlu0 %v287_v20  ;;  %v301_v31 = vadd.f32 %v300_v22, %v266_v19  ;;  %v273_v33 = vld [vmem:[%s1956_s5 + $0xa8] sm:$0xff]  ;;  %v274_v34 = vld [vmem:[%s1956_s5 + $0xb0] sm:$0xff]  ;;  %v276_v38 = vld [vmem:[%s1956_s5 + $0xc0] sm:$0xff]  ;;  %v2023_v4 = vsub.s32 5, %v2005_v61  ;;  %v2026_v5 = vsub.s32 6, %v2005_v61  ;;  %v2029_v6 = vsub.s32 7, %v2005_v61 }
  0x6f   : > { %v297_v35 = vadd.f32 %v296_v25, %v263_v21  ;;  %v306_v36 = vadd.f32 %v305_v28, %v270_v27  ;;  %v310_v37 = vadd.f32 %v273_v33, %v272_v29  ;;  %v277_v39 = vld [vmem:[%s1956_s5 + $0xc8] sm:$0xff]  ;;  %v278_v40 = vld [vmem:[%s1956_s5 + $0xd0] sm:$0xff]  ;;  %v280_v42 = vld [vmem:[%s1956_s5 + $0xe0] sm:$0xff]  ;;  %v2032_v8 = vsub.s32 %v595_v62, %v2005_v61 }
  0x70   : > { %v315_v41 = vadd.f32 %v277_v39, %v276_v38  ;;  %v281_v43 = vld [vmem:[%s1956_s5 + $0xe8] sm:$0xff]  ;;  %v302_v44 = vadd.f32 %v301_v31, %v267_v26  ;;  %v275_v48 = vld [vmem:[%s1956_s5 + $0xb8] sm:$0xff]  ;;  %v282_v50 = vld [vmem:[%s1956_s5 + $0xf0] sm:$0xff]  ;;  %vm1058_vm7 = vcmask 523712   ;;  %vm1076_vm8 = vcmask 516096  }
  0x71   : > { %298 = vadd.xlane.f32.xlu1 %v297_v35  ;;  %v311_v45 = vadd.f32 %v310_v37, %v274_v34  ;;  %v320_v46 = vadd.f32 %v281_v43, %v280_v42  ;;  %v307_v47 = vadd.f32 %v306_v36, %v271_v32  ;;  %v279_v51 = vld [vmem:[%s1956_s5 + $0xd8] sm:$0xff]  ;;  %vm1759_vm9 = vmmov (!%p1390_p3), 0  }
  0x72   : > { %293 = vadd.xlane.f32.xlu0 %v292_v30  ;;  %v316_v49 = vadd.f32 %v315_v41, %v278_v40  ;;  %v283_v55 = vld [vmem:[%s1956_s5 + $0xf8] sm:$0xff]  ;;  %vm1094_vm10 = vcmask (!%p1390_p3), 523264   ;;  %vm1170_vm11 = vcmask (!%p1390_p3), 24576   ;;  %vm1191_vm12 = vcmask (!%p1390_p3), 1043456  }
  0x73   : > { %v312_v52 = vadd.f32 %v311_v45, %v275_v48  ;;  %v321_v53 = vadd.f32 %v320_v46, %v282_v50  ;;  %vm1187_vm13 = vcmask (!%p1390_p3), 31744  }
  0x74   : > { %v317_v54 = vadd.f32 %v316_v49, %v279_v51 }
  0x75   : > { %303 = vadd.xlane.f32.xlu1 %v302_v44  ;;  %v322_v56 = vadd.f32 %v321_v53, %v283_v55 }
  0x76   : > { %308 = vadd.xlane.f32.xlu0 %v307_v47 }
  0x79   : > { %313 = vadd.xlane.f32.xlu1 %v312_v52 }
  0x7a   : > { %318 = vadd.xlane.f32.xlu0 %v317_v54 }
  0x7d   : > { %323 = vadd.xlane.f32.xlu1 %v322_v56 }
  0xfb   : > { %v289_v7 = vpop.xlane.xlu0 %288 }
  0xfc   : > { %v336_v9 = vrot.slane %v289_v7, %v2008_v63  ;;  %v340_v10 = vrot.slane %v289_v7, %v2011_v0  ;;  %v344_v11 = vrot.slane %v289_v7, %v2014_v1  ;;  %v348_v12 = vrot.slane %v289_v7, %v2017_v2 }
  0xfd   : > { %v352_v13 = vrot.slane %v289_v7, %v2020_v3  ;;  %v356_v14 = vrot.slane %v289_v7, %v2023_v4  ;;  %v360_v15 = vrot.slane %v289_v7, %v2026_v5  ;;  %v364_v16 = vrot.slane %v289_v7, %v2029_v6 }
  0xfe   : > { %v299_v17 = vpop.xlane.xlu1 %298  ;;  %v589_v18 = vcombine.low %v336_v9, %v340_v10  ;;  %v590_v19 = vcombine.low %v344_v11, %v348_v12 }
  0xff   : > { %v294_v20 = vpop.xlane.xlu0 %293  ;;  %v591_v21 = vcombine.low %v352_v13, %v356_v14  ;;  %v592_v22 = vcombine.low %v360_v15, %v364_v16  ;;  %v400_v23 = vrot.slane %v299_v17, %v2008_v63  ;;  %v404_v24 = vrot.slane %v299_v17, %v2011_v0 }
 0x100   : > { %v599_v25 = vrot.slane %v589_v18, %v2032_v8  ;;  %v606_v26 = vrot.slane %v590_v19, %v2032_v8  ;;  %v368_v27 = vrot.slane %v294_v20, %v2008_v63  ;;  %v372_v28 = vrot.slane %v294_v20, %v2011_v0 }
 0x101   : > { %v613_v29 = vrot.slane %v591_v21, %v2032_v8  ;;  %v620_v30 = vrot.slane %v592_v22, %v2032_v8  ;;  %v376_v31 = vrot.slane %v294_v20, %v2014_v1  ;;  %v380_v32 = vrot.slane %v294_v20, %v2017_v2 }
 0x102   : > { %v621_v33 = vcombine.low %v599_v25, %v606_v26  ;;  %v384_v34 = vrot.slane %v294_v20, %v2020_v3  ;;  %v388_v35 = vrot.slane %v294_v20, %v2023_v4  ;;  %v392_v36 = vrot.slane %v294_v20, %v2026_v5  ;;  %v304_v45 = vpop.xlane.xlu1 %303 }
 0x103   : > { %v622_v37 = vcombine.low %v613_v29, %v620_v30  ;;  %v396_v38 = vrot.slane %v294_v20, %v2029_v6  ;;  %v638_v39 = vcombine.low %v368_v27, %v372_v28  ;;  %v639_v40 = vcombine.low %v376_v31, %v380_v32 }
 0x104   : > { %v629_v41 = vrot.slane %v621_v33, %v2032_v8  ;;  %v640_v42 = vcombine.low %v384_v34, %v388_v35  ;;  %v408_v43 = vrot.slane %v299_v17, %v2014_v1  ;;  %v412_v44 = vrot.slane %v299_v17, %v2017_v2 }
 0x105   : > { %v636_v46 = vrot.slane %v622_v37, %v2032_v8  ;;  %v641_v47 = vcombine.low %v392_v36, %v396_v38  ;;  %v648_v48 = vrot.slane %v638_v39, %v2032_v8  ;;  %v655_v49 = vrot.slane %v639_v40, %v2032_v8 }
 0x106   : > { %v662_v50 = vrot.slane %v640_v42, %v2032_v8  ;;  %v416_v51 = vrot.slane %v299_v17, %v2020_v3  ;;  %v420_v52 = vrot.slane %v299_v17, %v2023_v4  ;;  %v424_v53 = vrot.slane %v299_v17, %v2026_v5  ;;  %v314_v38 = vpop.xlane.xlu1 %313 }
 0x107   : > { %v637_v54 = vcombine.low %v629_v41, %v636_v46  ;;  %v669_v55 = vrot.slane %v641_v47, %v2032_v8  ;;  %v670_v56 = vcombine.low %v648_v48, %v655_v49  ;;  %v428_v57 = vrot.slane %v299_v17, %v2029_v6  ;;  %v309_v17 = vpop.xlane.xlu0 %308 }
 0x108   : > { %v687_v59 = vcombine.low %v400_v23, %v404_v24  ;;  %v688_v60 = vcombine.low %v408_v43, %v412_v44  ;;  %v689_v62 = vcombine.low %v416_v51, %v420_v52  ;;  %v432_v7 = vrot.slane %v304_v45, %v2008_v63 }
 0x109   : > { %982 = vperm.xlu0 %1567, %v637_v54   ;;  %v671_v9 = vcombine.low %v662_v50, %v669_v55  ;;  %v678_v10 = vrot.slane %v670_v56, %v2032_v8  ;;  %v690_v11 = vcombine.low %v424_v53, %v428_v57  ;;  %v436_v12 = vrot.slane %v304_v45, %v2011_v0 }
 0x10a   : > { %v697_v13 = vrot.slane %v687_v59, %v2032_v8  ;;  %v704_v14 = vrot.slane %v688_v60, %v2032_v8  ;;  %v711_v15 = vrot.slane %v689_v62, %v2032_v8  ;;  %v440_v16 = vrot.slane %v304_v45, %v2014_v1 }
 0x10b   : > { %v685_v18 = vrot.slane %v671_v9, %v2032_v8  ;;  %v718_v19 = vrot.slane %v690_v11, %v2032_v8  ;;  %v444_v20 = vrot.slane %v304_v45, %v2017_v2  ;;  %v448_v21 = vrot.slane %v304_v45, %v2020_v3  ;;  %v319_v60 = vpop.xlane.xlu0 %318 }
 0x10c   : > { %v719_v22 = vcombine.low %v697_v13, %v704_v14  ;;  %v452_v23 = vrot.slane %v304_v45, %v2023_v4  ;;  %v456_v24 = vrot.slane %v304_v45, %v2026_v5  ;;  %v460_v25 = vrot.slane %v304_v45, %v2029_v6 }
 0x10d   : > { %v686_v26 = vcombine.low %v678_v10, %v685_v18  ;;  %v720_v27 = vcombine.low %v711_v15, %v718_v19  ;;  %v736_v28 = vcombine.low %v432_v7, %v436_v12  ;;  %v737_v29 = vcombine.low %v440_v16, %v444_v20 }
 0x10e   : > { %v727_v30 = vrot.slane %v719_v22, %v2032_v8  ;;  %v738_v31 = vcombine.low %v448_v21, %v452_v23  ;;  %v739_v32 = vcombine.low %v456_v24, %v460_v25  ;;  %v464_v33 = vrot.slane %v309_v17, %v2008_v63 }
 0x10f   : > { %985 = vperm.xlu1 %1568, %v686_v26   ;;  %v734_v34 = vrot.slane %v720_v27, %v2032_v8  ;;  %v746_v35 = vrot.slane %v736_v28, %v2032_v8  ;;  %v753_v36 = vrot.slane %v737_v29, %v2032_v8  ;;  %v468_v37 = vrot.slane %v309_v17, %v2011_v0 }
 0x110   : > { %v760_v39 = vrot.slane %v738_v31, %v2032_v8  ;;  %v767_v40 = vrot.slane %v739_v32, %v2032_v8  ;;  %v472_v41 = vrot.slane %v309_v17, %v2014_v1  ;;  %v476_v42 = vrot.slane %v309_v17, %v2017_v2  ;;  %v324_v31 = vpop.xlane.xlu1 %323 }
 0x111   : > { %v735_v43 = vcombine.low %v727_v30, %v734_v34  ;;  %v768_v44 = vcombine.low %v746_v35, %v753_v36  ;;  %v480_v45 = vrot.slane %v309_v17, %v2020_v3  ;;  %v484_v46 = vrot.slane %v309_v17, %v2023_v4 }
 0x112   : > { %v769_v47 = vcombine.low %v760_v39, %v767_v40  ;;  %v488_v48 = vrot.slane %v309_v17, %v2026_v5  ;;  %v492_v49 = vrot.slane %v309_v17, %v2029_v6  ;;  %v785_v50 = vcombine.low %v464_v33, %v468_v37 }
 0x113   : > { %988 = vperm.xlu1 %1568, %v735_v43   ;;  %v776_v51 = vrot.slane %v768_v44, %v2032_v8  ;;  %v786_v52 = vcombine.low %v472_v41, %v476_v42  ;;  %v787_v53 = vcombine.low %v480_v45, %v484_v46  ;;  %v496_v54 = vrot.slane %v314_v38, %v2008_v63 }
 0x114   : > { %v783_v55 = vrot.slane %v769_v47, %v2032_v8  ;;  %v788_v56 = vcombine.low %v488_v48, %v492_v49  ;;  %v795_v57 = vrot.slane %v785_v50, %v2032_v8  ;;  %v500_v59 = vrot.slane %v314_v38, %v2011_v0 }
 0x115   : > { %v802_v62 = vrot.slane %v786_v52, %v2032_v8  ;;  %v809_v7 = vrot.slane %v787_v53, %v2032_v8  ;;  %v504_v9 = vrot.slane %v314_v38, %v2014_v1  ;;  %v508_v10 = vrot.slane %v314_v38, %v2017_v2 }
 0x116   : > { %v784_v11 = vcombine.low %v776_v51, %v783_v55  ;;  %v816_v12 = vrot.slane %v788_v56, %v2032_v8  ;;  %v512_v13 = vrot.slane %v314_v38, %v2020_v3  ;;  %v516_v14 = vrot.slane %v314_v38, %v2023_v4 }
 0x117   : > { %v817_v15 = vcombine.low %v795_v57, %v802_v62  ;;  %v520_v16 = vrot.slane %v314_v38, %v2026_v5  ;;  %v524_v17 = vrot.slane %v314_v38, %v2029_v6  ;;  %v834_v18 = vcombine.low %v496_v54, %v500_v59 }
 0x118   : > { %991 = vperm.xlu1 %1568, %v784_v11   ;;  %v818_v19 = vcombine.low %v809_v7, %v816_v12  ;;  %v835_v20 = vcombine.low %v504_v9, %v508_v10  ;;  %v836_v21 = vcombine.low %v512_v13, %v516_v14  ;;  %v528_v22 = vrot.slane %v319_v60, %v2008_v63 }
 0x119   : > { %v825_v23 = vrot.slane %v817_v15, %v2032_v8  ;;  %v837_v24 = vcombine.low %v520_v16, %v524_v17  ;;  %v844_v25 = vrot.slane %v834_v18, %v2032_v8  ;;  %v532_v26 = vrot.slane %v319_v60, %v2011_v0 }
 0x11a   : > { %v832_v27 = vrot.slane %v818_v19, %v2032_v8  ;;  %v851_v28 = vrot.slane %v835_v20, %v2032_v8  ;;  %v858_v29 = vrot.slane %v836_v21, %v2032_v8  ;;  %v536_v30 = vrot.slane %v319_v60, %v2014_v1 }
 0x11b   : > { %v865_v32 = vrot.slane %v837_v24, %v2032_v8  ;;  %v540_v33 = vrot.slane %v319_v60, %v2017_v2  ;;  %v544_v34 = vrot.slane %v319_v60, %v2020_v3  ;;  %v548_v35 = vrot.slane %v319_v60, %v2023_v4 }
 0x11c   : > { %v833_v36 = vcombine.low %v825_v23, %v832_v27  ;;  %v866_v37 = vcombine.low %v844_v25, %v851_v28  ;;  %v552_v38 = vrot.slane %v319_v60, %v2026_v5  ;;  %v556_v39 = vrot.slane %v319_v60, %v2029_v6 }
 0x11d   : > { %v867_v40 = vcombine.low %v858_v29, %v865_v32  ;;  %v883_v41 = vcombine.low %v528_v22, %v532_v26  ;;  %v884_v42 = vcombine.low %v536_v30, %v540_v33  ;;  %v885_v43 = vcombine.low %v544_v34, %v548_v35 }
 0x11e   : > { %994 = vperm.xlu1 %1568, %v833_v36   ;;  %v874_v44 = vrot.slane %v866_v37, %v2032_v8  ;;  %v886_v45 = vcombine.low %v552_v38, %v556_v39  ;;  %v560_v46 = vrot.slane %v324_v31, %v2008_v63  ;;  %v564_v47 = vrot.slane %v324_v31, %v2011_v0 }
 0x11f   : > { %v881_v48 = vrot.slane %v867_v40, %v2032_v8  ;;  %v893_v49 = vrot.slane %v883_v41, %v2032_v8  ;;  %v900_v50 = vrot.slane %v884_v42, %v2032_v8  ;;  %v907_v51 = vrot.slane %v885_v43, %v2032_v8 }
 0x120   : > { %v914_v52 = vrot.slane %v886_v45, %v2032_v8  ;;  %v568_v53 = vrot.slane %v324_v31, %v2014_v1  ;;  %v572_v54 = vrot.slane %v324_v31, %v2017_v2  ;;  %v576_v55 = vrot.slane %v324_v31, %v2020_v3 }
 0x121   : > { %v882_v56 = vcombine.low %v874_v44, %v881_v48  ;;  %v915_v63 = vcombine.low %v893_v49, %v900_v50  ;;  %v580_v0 = vrot.slane %v324_v31, %v2023_v4  ;;  %v584_v57 = vrot.slane %v324_v31, %v2026_v5 }
 0x122   : > { %v916_v59 = vcombine.low %v907_v51, %v914_v52  ;;  %v588_v60 = vrot.slane %v324_v31, %v2029_v6  ;;  %v932_v62 = vcombine.low %v560_v46, %v564_v47  ;;  %v933_v7 = vcombine.low %v568_v53, %v572_v54 }
 0x123   : > { %997 = vperm.xlu1 %1568, %v882_v56   ;;  %v923_v9 = vrot.slane %v915_v63, %v2032_v8  ;;  %v934_v10 = vcombine.low %v576_v55, %v580_v0  ;;  %v1006_v20 = vand.u32 127, %v333_v58  ;;  %v284_v56 = vld [vmem:[#allocation2] sm:$0x1] }
 0x124   : > { %v930_v1 = vrot.slane %v916_v59, %v2032_v8  ;;  %v935_v2 = vcombine.low %v584_v57, %v588_v60  ;;  %v942_v3 = vrot.slane %v932_v62, %v2032_v8  ;;  %v949_v11 = vrot.slane %v933_v7, %v2032_v8  ;;  %v1087_v57 = vld [vmem:[%s2252_s1 + $0x8] sm:$0xff] (!%p1390_p3)  ;;  %v1088_v59 = vld [vmem:[%s2252_s1 + $0x10] sm:$0xff] (!%p1390_p3)  ;;  %v1089_v62 = vld [vmem:[%s2252_s1 + $0x18] sm:$0xff] (!%p1390_p3) }
 0x125   : > { %v956_v4 = vrot.slane %v934_v10, %v2032_v8  ;;  %v1011_v22 = vadd.s32 4294967288, %v1006_v20  ;;  %v1018_v23 = vadd.s32 4294967280, %v1006_v20  ;;  %v1025_v24 = vadd.s32 4294967272, %v1006_v20  ;;  %v1090_v10 = vld [vmem:[%s2252_s1 + $0x20] sm:$0xff] (!%p1390_p3) }
 0x126   : > { %v931_v12 = vcombine.low %v923_v9, %v930_v1  ;;  %v963_v5 = vrot.slane %v935_v2, %v2032_v8  ;;  %v964_v13 = vcombine.low %v942_v3, %v949_v11  ;;  %v1032_v25 = vadd.s32 4294967264, %v1006_v20  ;;  %v1091_v1 = vld [vmem:[%s2252_s1 + $0x28] sm:$0xff] (!%p1390_p3)  ;;  %v1092_v3 = vld [vmem:[%s2252_s1 + $0x30] sm:$0xff] (!%p1390_p3)  ;;  %v1093_v11 = vld [vmem:[%s2252_s1 + $0x38] sm:$0xff] (!%p1390_p3) }
 0x127   : > { %v1014_v26 = vsub.s32 %v1011_v22, %v2005_v61  ;;  %v1039_v27 = vadd.s32 4294967256, %v1006_v20  ;;  %v1021_v29 = vsub.s32 %v1018_v23, %v2005_v61  ;;  %v1046_v30 = vadd.s32 4294967248, %v1006_v20  ;;  %v1186_v22 = vld [vmem:[%s2253_s2] sm:$0xf] (!%p1390_p3) }
 0x128   : > { %1000 = vperm.xlu1 %1568, %v931_v12   ;;  %v965_v6 = vcombine.low %v956_v4, %v963_v5  ;;  %v972_v14 = vrot.slane %v964_v13, %v2032_v8  ;;  %v1009_v31 = vsub.s32 %v1006_v20, %v2005_v61  ;;  %v1028_v32 = vsub.s32 %v1025_v24, %v2005_v61 }
 0x129   : > { %v1035_v34 = vsub.s32 %v1032_v25, %v2005_v61  ;;  %v1042_v35 = vsub.s32 %v1039_v27, %v2005_v61  ;;  %v1053_v36 = vadd.s32 4294967240, %v1006_v20  ;;  %v1049_v38 = vsub.s32 %v1046_v30, %v2005_v61 }
 0x12a   : > { %v979_v15 = vrot.slane %v965_v6, %v2032_v8  ;;  %v1760_v7 = vmov (!%p1390_p3), 0.0   ;;  %v1437_v9 = vpack.c.bf16 (!%p1390_p3), %v1089_v62, %v1088_v59  ;;  %v1440_v2 = vpack.c.bf16 (!%p1390_p3), %v1091_v1, %v1090_v10 }
 0x12b   : > { %v1056_v45 = vsub.s32 %v1053_v36, %v2005_v61  ;;  %v1086_v61 = vld [vmem:[%s2252_s1] sm:$0xff] (!%p1390_p3)  ;;  %1425 = vmatprep.mubr.msk.f32.mxu0 (!%p1390_p3), %vm1759_vm9, %v1760_v7  ;;  %1428 = vmatprep.subr.mxu1 (!%p1390_p3), %v1760_v7  ;;  %v1443_v4 = vpack.c.bf16 (!%p1390_p3), %v1093_v11, %v1092_v3  ;;  %v1168_v13 = vstv (!%p1390_p3), %s1084_s29 }
 0x12c   : > { %v980_v16 = vcombine.low %v972_v14, %v979_v15  ;;  %v1434_v60 = vpack.c.bf16 (!%p1390_p3), %v1087_v57, %v1086_v61  ;;  %1430 = vmatprep.mubr.msk.f32.mxu1 (!%p1390_p3), %vm1759_vm9, %v1760_v7  ;;  %1429 = vmatpush3.msk.msra.mxu1 (!%p1390_p3), %vm1191_vm12, %v1186_v22 }
 0x12e   : > { %1003 = vperm.xlu1 %1568, %v980_v16  }
 0x188   : > { %v983_v33 = vpop.permute.xlu0 %982 }
 0x189   : > { %v1010_v40 = vrot.slane %v983_v33, %v1009_v31 }
 0x18e   : > { %v986_v17 = vpop.permute.xlu1 %985 }
 0x18f   : > { %v1015_v58 = vrot.slane %v986_v17, %v1014_v26  ;;  %v1183_v26 = vstv (!%p1390_p3), %s1391_s27 }
 0x191   : > { %v1017_v43 = vsel %vm1016_vm1, %v1015_v58, %v1010_v40 }
 0x192   : > { %v989_v18 = vpop.permute.xlu1 %988 }
 0x193   : > { %v1022_v37 = vrot.slane %v989_v18, %v1021_v29 }
 0x195   : > { %v1024_v46 = vsel %vm1023_vm2, %v1022_v37, %v1017_v43 }
 0x197   : > { %v992_v19 = vpop.permute.xlu1 %991 }
 0x198   : > { %v1029_v41 = vrot.slane %v992_v19, %v1028_v32 }
 0x19a   : > { %v1031_v48 = vsel %vm1030_vm3, %v1029_v41, %v1024_v46 }
 0x19d   : > { %v995_v21 = vpop.permute.xlu1 %994 }
 0x19e   : > { %v1036_v42 = vrot.slane %v995_v21, %v1035_v34 }
 0x1a0   : > { %v1038_v49 = vsel %vm1037_vm4, %v1036_v42, %v1031_v48 }
 0x1a2   : > { %v998_v28 = vpop.permute.xlu1 %997 }
 0x1a3   : > { %v1043_v44 = vrot.slane %v998_v28, %v1042_v35 }
 0x1a5   : > { %v1045_v51 = vsel %vm1044_vm5, %v1043_v44, %v1038_v49 }
 0x1a7   : > { %v1001_v39 = vpop.permute.xlu1 %1000 }
 0x1a8   : > { %v1050_v47 = vrot.slane %v1001_v39, %v1049_v38 }
 0x1aa   : > { %v1052_v53 = vsel %vm1051_vm6, %v1050_v47, %v1045_v51 }
 0x1ad   : > { %v1004_v50 = vpop.permute.xlu1 %1003 }
 0x1ae   : > { %v1057_v52 = vrot.slane %v1004_v50, %v1056_v45 }
 0x1b0   : > { %v1059_v54 = vsel %vm1058_vm7, %v1057_v52, %v1052_v53 }
 0x1b1   : > { %v1066_v55 = vrot.slane %v1059_v54, %v2032_v8  ;;  %1081 = sbr.rel (%p1390_p3) target bundleno = 1227 (0x4cb), region = 52 }
 0x1b3   : > { %v1073_v63 = vrot.slane %v1066_v55, %v2032_v8  ;;  %v1758_v8 = vmov (!%p1390_p3), 0.0|0.0  }
 0x1b4   : > { %1433 = vmatprep.subr.bf16.mxu0 (!%p1390_p3), %v1758_v8 }
 0x1b5   : > { %v1075_v0 = vadd.f32 %v1073_v63, %v284_v56  ;;  %1435 = vmatpush3.bf16.msra.mxu0 (!%p1390_p3), %v1434_v60 }
 0x1b6   : > { %1436 = vmatprep.subr.bf16.mxu0 (!%p1390_p3), %v1758_v8 }
 0x1b7   : > { %1077 = vst.msk [vmem:[#allocation2] sm:$0x1] %vm1076_vm8, %v1075_v0 }
 0x1b9   : > { %1438 = vmatpush3.bf16.msra.mxu0 %v1437_v9 }
 0x1ba   : > { %1439 = vmatprep.subr.bf16.mxu0 %v1758_v8 }
 0x1bd   : > { %1441 = vmatpush3.bf16.msra.mxu0 %v1440_v2 }
 0x1be   : > { %v1082_v12 = vld [vmem:[#allocation2] sm:$0x1]  ;;  %1442 = vmatprep.subr.bf16.mxu0 %v1758_v8 }
 0x1bf   : > { %v1083_v5 = vmul.f32 0.0009765625, %v1082_v12 }
 0x1c1   : > { %1444 = vmatpush3.bf16.msra.mxu0 %v1443_v4 }
 0x1c4   : > { %1426 = vmatmul.mubr.msk.f32.vlgmr.msra.gmra.mrb[0].mxu0 %vm1094_vm10, %v1083_v5 }
 0x297   : > { %v1164_v6 = vpop.f32.mrb[0].mxu0 }
 0x298   : > { %v1427_v14 = vpop.f32.mrb[1].mxu0  ;;  %v1169_v15 = vmul.f32 %v1168_v13, %v1164_v6 }
 0x29a   : > { %v1171_v16 = vsel %vm1170_vm11, %v1169_v15, -inf }
 0x29b   : > { %1172 = vmax.xlane.f32.xlu0 %v1171_v16 }
 0x328   : > { %v1173_v17 = vpop.xlane.xlu0 %1172 }
 0x329   : > { %v1174_v18 = vsub.f32 %v1169_v15, %v1173_v17 }
 0x32b   : > { %v1175_v19 = vmul.f32 1.442695, %v1174_v18 }
 0x32d   : > { %1569 = vpow2.f32 %v1175_v19 }
 0x337   : > { %v1570_v20 = vpop.eup %1569 }
 0x338   : > { %v1177_v21 = vsel %vm1170_vm11, %v1570_v20, 0.0 }
 0x339   : > { %1178 = vadd.xlane.f32.xlu0 %v1177_v21 }
 0x3c6   : > { %v1179_v23 = vpop.xlane.xlu0 %1178 }
 0x3c7   : > { %1571 = vrcp.f32 %v1179_v23 }
 0x3d1   : > { %v1572_v24 = vpop.eup %1571 }
 0x3d2   : > { %v1181_v25 = vmul.f32 %v1572_v24, %v1570_v20 }
 0x3d4   : > { %v1182_v27 = vmul.f32 %v1181_v25, %v1164_v6 }
 0x3d6   : > { %v1184_v28 = vmul.f32 %v1183_v26, %v1182_v27 }
 0x3d8   : > { %v1185_v29 = vmax.f32 %v1184_v28, 0.0 }
 0x3da   : > { %1431 = vmatmul.mubr.msk.f32.vlgmr.msra.gmra.mrb[0].mxu1 %vm1187_vm13, %v1185_v29 }
 0x4ad   : > { %v1261_v30 = vpop.f32.mrb[0].mxu1 }
 0x4ae   : > { %v1265_v31 = vsub.f32 0.0, %v1261_v30  ;;  %v1432_v32 = vpop.f32.mrb[1].mxu1 }
 0x4b0   : > { %v1266_v33 = vmul.f32 1.442695, %v1265_v31 }
 0x4b2   : > { %1573 = vpow2.f32 %v1266_v33 }
 0x4bc   : > { %v1574_v34 = vpop.eup %1573 }
 0x4bd   : > { %v1268_v58 = vadd.f32 1.0, %v1574_v34 }
 0x4bf   : > { %1575 = vrcp.f32 %v1268_v58 }
 0x4c9   : > { %v1576_v35 = vpop.eup %1575 }
 0x4ca   : > { %1271 = vst.msk [vmem:[%s1969_s12] sm:$0x1] %vm1076_vm8, %v1576_v35 }
 0x4cb PF: > { %s1395_s11 = sshll.u32 %s1736_s22, 4  ;;  %s1285_s21 = sshll.u32 %s1969_s12, 4  ;;  %s1286_s21 = int_to_ptr.vmem [resolvable:$true] %s1285_s21 }
 0x4cc   : > { %s2192_s28 = scalar_lea.hbm %s2255_s4, %s1395_s11  ;;  %s1273_s10 = scalar_lea.sflag [#allocation5], %s243_s23 }
 0x4cd   : > { %s1622_s3 = scalar_lea.vmem %s1286_s21, 16  ;;  %p2285_p4 = scmp.ne.s32.totalorder %s2273_s7, 0 }
 0x4ce   : > { %p1623_p13 = scmp.ne.s32.totalorder %s1286_s21, %s1622_s3  ;;  %s1761_s15 = smov [#allocation8]  }
 0x4cf   : > { %s1626_s25 = sshll.u32 %s1761_s15, 4  ;;  %s1627_s25 = int_to_ptr.vmem [resolvable:$false] %s1626_s25 }
 0x4d0   : > { %p1624_p6 = pnand %p1623_p13, %p2285_p4  ;;  %s1628_s8 = scalar_lea.vmem %s1627_s25, 32 }
 0x4d1   : > { %p1629_p12 = scmp.lt.s32.totalorder %s1286_s21, %s1627_s25  ;;  %p1630_p0 = scmp.lt.s32.totalorder %s1628_s8, %s1622_s3 }
 0x4d2   : > { %p1625_p10 = pneg %p1624_p6 }
 0x4d3   : > { %p1631_p2 = por %p1630_p0, %p1629_p12 }
 0x4d5   : > { %p1632_p8 = pnand %p1631_p2, %p1625_p10 }
 0x4d7   : > { %1635 = shalt.err (!%p1632_p8)
}
 0x4d8   : > { %s1636_s22 = scalar_lea.hbm %s2192_s28, 16  ;;  %s1640_s26 = scalar_lea.hbm %s2255_s4, 32 }
 0x4d9   : > { %p1637_p9 = scmp.ne.s32.totalorder %s2192_s28, %s1636_s22  ;;  %p1641_p5 = scmp.lt.u32.totalorder %s2192_s28, %s2255_s4 }
 0x4da   : > { %p1642_p7 = scmp.lt.u32.totalorder %s1640_s26, %s1636_s22  ;;  %p1644_p13 = scmp.lt.u32.totalorder %s1636_s22, %s2192_s28 }
 0x4db   : > { %p1638_p11 = pnand %p1637_p9, %p2285_p4 }
 0x4dc   : > { %p1643_p3 = por %p1642_p7, %p1641_p5 }
 0x4dd   : > { %p1639_p1 = pneg %p1638_p11 }
 0x4de   : > { %p1645_p6 = por %p1644_p13, %p1643_p3 }
 0x4e0   : > { %p1646_p10 = pnand %p1645_p6, %p1639_p1 }
 0x4e2   : > { %1649 = shalt.err (!%p1646_p10)
}
 0x4e3   : > { %1451 = dma.vmem_to_hbm [thread:$0]  (%p2285_p4), %s1286_s21, 16, %s2192_s28, %s1273_s10  }
 0x4e4 PF: > { %s2286_s6 = sld [smem:[#allocation14_spill]]  ;;  %s2287_s13 = sld [smem:[#allocation12_spill]] }
 0x4e5   : > { %s2288_s27 = sld [smem:[#allocation15_spill]] }
 0x4ea   : > { %p1468_p12 = scmp.ge.s32.totalorder %s2286_s6, 2  ;;  %s1297_s11 = sand.u32 1, %s2287_s13  }
 0x4eb   : > { %p2289_p0 = scmp.ne.s32.totalorder %s2288_s27, 0  ;;  %s1298_s18 = scalar_lea.sflag [#allocation5], %s1297_s11 }
 0x4ed   : > { %p1462_p2 = pnand %p1468_p12, %p2289_p0 }
 0x4ef   : > { %1703 = dma.done.wait (!%p1462_p2), %s1298_s18, 16  }
 0x4f0   : > { %1705 = vsyncadd (!%p1462_p2), %s1298_s18, 4294967280  ;;  %s21_s25 = sadd.s32 1, %s2286_s6   ;;  %s2290_s21 = sld [smem:[#allocation13_spill]] }
 0x4f1   : > { %p18_p8 = scmp.ge.s32.totalorder %s21_s25, 6   ;;  %s2291_s23 = sld [smem:[#allocation16_spill]] }
 0x4f2   : > { %s2292_s7 = sld [smem:[#allocation17_spill]]  ;;  %s2293_s15 = smov %s1712_s16 }
 0x4f3   : > { %s2294_s16 = smov %s1716_s17  ;;  %s2295_s17 = smov %s1918_s30 }
 0x4f4   : > { %s2296_s18 = smov %s1724_s19  ;;  %s2297_s19 = smov %s1728_s20 }
 0x4f5   : > { %s2298_s20 = smov %s1923_s14  ;;  %s2299_s22 = smov %s1744_s24 }
 0x4f6   :  { %20 = sbr.rel (!%p18_p8) target bundleno = 12 (0xc), region = 94 }
 0x4f8   : > { %s2300_s24 = smov %s2292_s7 }
 0x4fd   :  { %1302 = vsyncpa [#allocation4], 1 }
 0x4fe   :  { %1304 = vsyncpa [#allocation4 + $0x1], 1 }
 0x4ff   :  { %1305 = vsyncpa [#allocation5], 1 }
 0x500   :  { %1307 = vsyncpa [#allocation5 + $0x1], 1 }
 0x501   :  { %1308 = vsyncpa [#allocation6], 1 }
 0x502   :  { %1310 = vsyncpa [#allocation6 + $0x1], 1 }

</bundles_post_ra>
